<compile_context>
chip_gen: v6e
topology: v6e:2x2x1
jax: 0.10.0
libtpu: 0.0.40
codegen_flags: <defaults>
</compile_context>

<pallas_src>
import functools

import jax
import jax.numpy as jnp
from jax.experimental import pallas as pl
from jax.experimental.pallas import tpu as pltpu

SUBLANE = 8
_SPLIT_THRESHOLD = 2048  # split a single-tile batch in two above this size (v7x TCs)


def _round_up(n, m):
    return ((n + m - 1) // m) * m


def linear_kernel(x_ref, w_ref, b_ref, o_ref):
    # MXU matmul with f32 accumulation; f32 bias-add epilogue on the VPU.
    acc = jnp.dot(x_ref[...], w_ref[...], preferred_element_type=jnp.float32)
    o_ref[...] = (acc + b_ref[...]).astype(o_ref.dtype)


def _choose_tile(batch, block_batch):
    """Pick a batch-tile size.

    Legality: the block's second-to-last dim must be a multiple of 8 OR equal
    to the full batch extent (Pallas masks the partial last grid block either
    way). Large-but-single-tile batches are split in two so the "parallel"
    batch axis still gives both v7x TensorCores work.
    """
    if batch <= block_batch:
        if batch >= _SPLIT_THRESHOLD:
            return _round_up(pl.cdiv(batch, 2), SUBLANE)
        return batch  # full-extent block is always legal
    return max((block_batch // SUBLANE) * SUBLANE, SUBLANE)


@functools.partial(jax.jit, static_argnames=("block_batch",))
def simple_model_forward(x, weight, bias, *, block_batch=8192):
    """Equivalent of PyTorch: y = x @ weight.T + bias   (nn.Linear(10, 2))

    x:      [B, 10]
    weight: [2, 10]   (PyTorch nn.Linear convention)
    bias:   [2]
    returns [B, 2]    float32
    """
    B, IN = x.shape
    OUT = weight.shape[0]

    tb = _choose_tile(B, block_batch)
    grid = (pl.cdiv(B, tb),)

    # Weight/bias are a few hundred bytes: transpose/cast/reshape here is free.
    w_t = weight.T.astype(x.dtype)                   # [IN, OUT], resident in VMEM
    b2d = bias.reshape(1, OUT).astype(jnp.float32)   # [1, OUT],  resident in VMEM

    cost = pl.CostEstimate(
        flops=2 * B * IN * OUT,
        transcendentals=0,
        bytes_accessed=(x.dtype.itemsize * B * IN
                        + w_t.dtype.itemsize * IN * OUT
                        + 4 * OUT
                        + 4 * B * OUT),
    )

    return pl.pallas_call(
        linear_kernel,
        out_shape=jax.ShapeDtypeStruct((B, OUT), jnp.float32),
        grid=grid,
        in_specs=[
            # x: streamed / double-buffered along the batch axis.
            pl.BlockSpec((tb, IN), lambda i: (i, 0)),
            # weight / bias: constant index_map -> stay resident across steps.
            pl.BlockSpec((IN, OUT), lambda i: (0, 0)),
            pl.BlockSpec((1, OUT), lambda i: (0, 0)),
        ],
        out_specs=pl.BlockSpec((tb, OUT), lambda i: (i, 0)),
        compiler_params=pltpu.CompilerParams(
            dimension_semantics=("parallel",),   # both TCs on v7x; no-op on v5e/v6e
            vmem_limit_bytes=48 * 1024 * 1024,   # fits 8192-row f32 tiles everywhere
        ),
        cost_estimate=cost,
    )(x, w_t, b2d)


if __name__ == "__main__":
    key = jax.random.PRNGKey(0)
    k_x, k_w, k_b, k_x2, k_x3 = jax.random.split(key, 5)

    in_features = 10
    out_features = 2

    # Deterministic synthetic parameters (shapes match nn.Linear(10, 2)).
    weight = jax.random.normal(k_w, (out_features, in_features), dtype=jnp.float32) * 0.1
    bias = jax.random.normal(k_b, (out_features,), dtype=jnp.float32) * 0.1

    # --- Small-batch path: single full-extent block, grid=1 ---
    batch = 8
    x = jax.random.normal(k_x, (batch, in_features), dtype=jnp.float32)
    y = simple_model_forward(x, weight, bias)
    jax.block_until_ready(y)
    y_ref = x @ weight.T + bias
    assert y.shape == (batch, out_features)
    assert jnp.allclose(y, y_ref, atol=1e-5), "small-batch mismatch vs reference"

    # --- Multi-tile grid with partial last block (no wrapper pad/slice) ---
    batch2 = 1000
    x2 = jax.random.normal(k_x2, (batch2, in_features), dtype=jnp.float32)
    y2 = simple_model_forward(x2, weight, bias, block_batch=256)
    jax.block_until_ready(y2)
    y2_ref = x2 @ weight.T + bias
    assert y2.shape == (batch2, out_features)
    assert jnp.allclose(y2, y2_ref, atol=1e-5), "multi-tile mismatch vs reference"

    # --- Split-in-two path (grid=2 so both v7x TCs would get work) ---
    batch3 = 3000
    x3 = jax.random.normal(k_x3, (batch3, in_features), dtype=jnp.float32)
    y3 = simple_model_forward(x3, weight, bias)
    jax.block_until_ready(y3)
    y3_ref = x3 @ weight.T + bias
    assert y3.shape == (batch3, out_features)
    assert jnp.allclose(y3, y3_ref, atol=1e-5), "split-tile mismatch vs reference"

    print("KERNEL_OK")
</pallas_src>

<mosaic_0001>
module attributes {stable_mosaic.version = 11 : i64} {
  func.func @linear_kernel(%arg0: i32, %arg1: memref<8x10xf32, #tpu.memory_space<vmem>>, %arg2: memref<10x2xf32, #tpu.memory_space<vmem>>, %arg3: memref<1x2xf32, #tpu.memory_space<vmem>>, %arg4: memref<8x2xf32, #tpu.memory_space<vmem>>) attributes {dimension_semantics = [#tpu.dimension_semantics<parallel>], iteration_bounds = array<i64: 1>, scalar_prefetch = 0 : i64, scratch_operands = 0 : i64, tpu.core_type = #tpu.core_type<tc>, window_params = [{transform_indices = @transform_0, window_bounds = array<i64: 8, 10>}, {pipeline_mode = #tpu.pipeline_mode<synchronous>, transform_indices = @transform_1, window_bounds = array<i64: 10, 2>}, {pipeline_mode = #tpu.pipeline_mode<synchronous>, transform_indices = @transform_2, window_bounds = array<i64: 1, 2>}, {transform_indices = @transform_3, window_bounds = array<i64: 8, 2>}]} {
    %c0 = arith.constant 0 : index
    %c0_0 = arith.constant 0 : index
    %0 = vector.load %arg1[%c0, %c0_0] : memref<8x10xf32, #tpu.memory_space<vmem>>, vector<8x10xf32>
    %c0_1 = arith.constant 0 : index
    %c0_2 = arith.constant 0 : index
    %1 = vector.load %arg2[%c0_1, %c0_2] : memref<10x2xf32, #tpu.memory_space<vmem>>, vector<10x2xf32>
    %cst = arith.constant dense<0.000000e+00> : vector<8x2xf32>
    %2 = tpu.matmul %0, %1, %cst {dimension_numbers = #tpu.dot_dimension_numbers<[1], [0], [0], [1], [0, 0, 1, 1], [], []>} : vector<8x10xf32>, vector<10x2xf32>, vector<8x2xf32> -> vector<8x2xf32>
    %c0_3 = arith.constant 0 : index
    %c0_4 = arith.constant 0 : index
    %3 = vector.load %arg3[%c0_3, %c0_4] : memref<1x2xf32, #tpu.memory_space<vmem>>, vector<1x2xf32>
    %4 = vector.broadcast %3 : vector<1x2xf32> to vector<8x2xf32>
    %5 = arith.addf %2, %4 : vector<8x2xf32>
    %c0_5 = arith.constant 0 : index
    %c0_6 = arith.constant 0 : index
    %6 = vector.load %arg4[%c0_5, %c0_6] : memref<8x2xf32, #tpu.memory_space<vmem>>, vector<8x2xf32>
    tpu.vector_store %arg4[%c0_5, %c0_6], %5 {strides = array<i32>} : memref<8x2xf32, #tpu.memory_space<vmem>>, vector<8x2xf32>,
    return
  }
  func.func @transform_0(%arg0: i32) -> (i32, i32) {
    %c0_i32 = arith.constant 0 : i32
    %c0_i32_0 = arith.constant 0 : i32
    return %arg0, %c0_i32 : i32, i32
  }
  func.func @transform_1(%arg0: i32) -> (i32, i32) {
    %c0_i32 = arith.constant 0 : i32
    %c0_i32_0 = arith.constant 0 : i32
    %c0_i32_1 = arith.constant 0 : i32
    return %c0_i32, %c0_i32_0 : i32, i32
  }
  func.func @transform_2(%arg0: i32) -> (i32, i32) {
    %c0_i32 = arith.constant 0 : i32
    %c0_i32_0 = arith.constant 0 : i32
    %c0_i32_1 = arith.constant 0 : i32
    return %c0_i32, %c0_i32_0 : i32, i32
  }
  func.func @transform_3(%arg0: i32) -> (i32, i32) {
    %c0_i32 = arith.constant 0 : i32
    %c0_i32_0 = arith.constant 0 : i32
    return %arg0, %c0_i32 : i32, i32
  }
}

</mosaic_0001>

<bundles_post_ra>
// kernel: simple_model_forward.1
= control target key start
LH: loop header
LB: loop body
LE: loop exit
PB: predicated region body
PF: predicated region fallthrough
CT: control target
= control target key end

     0   :  { %vm28_vm0 = vcmask 1041408   ;;  %v123_v0 = vmov 0.0   ;;  %vm124_vm1 = vmmov 0   ;;  %vm24_vm2 = vcmask 80896   ;;  %s160_s1 = inlined_call_operand.vmem [shape: f32[10,2], index: 1, kind: input, shape index: {}]   ;;  %s161_s0 = inlined_call_operand.vmem [shape: f32[8,10], index: 0, kind: input, shape index: {}]   ;;  %s162_s2 = inlined_call_operand.vmem [shape: f32[1,2], index: 2, kind: input, shape index: {}]   ;;  %s163_s3 = inlined_call_operand.vmem [shape: f32[8,2], index: 3, kind: output, shape index: {}]  }
   0x1   :  { %114 = vmatprep.subr.mxu0 %v123_v0  ;;  %v16_v1 = vld [vmem:[%s160_s1 + $0x8] sm:$0x3]  ;;  %v15_v2 = vld [vmem:[%s160_s1] sm:$0xff]  ;;  %118 = vmatprep.mubr.msk.f32.mxu0 %vm124_vm1, %v123_v0  ;;  %vm102_vm3 = vcmask 15360  }
   0x2   :  { %115 = vmatpush3.msk.msra.mxu0 %vm28_vm0, %v16_v1  ;;  %v14_v3 = vld [vmem:[%s161_s0] sm:$0xff] }
   0x3   :  { %116 = vmatprep.subr.mxu0 %v123_v0  ;;  %v108_v4 = vld [vmem:[%s162_s2] ss:$0 sm:$0xff] }
   0x4   :  { %117 = vmatpush3.msra.mxu0 %v15_v2 }
   0x5   :  { %119 = vmatmul.mubr.msk.f32.vlgmr.msra.gmra.mxu0 %vm24_vm2, %v14_v3 }
  0xc5   :  { %v98_v5 = vpop.f32.mrf.mxu0 }
  0xc6   :  { %v99_v6 = vadd.f32 %v108_v4, %v98_v5 }
  0xc7   :  { %v120_v7 = vpop.f32.mrf.mxu0 }
  0xc8   :  { %103 = vst.msk [vmem:[%s163_s3] sm:$0xff] %vm102_vm3, %v99_v6 }

</bundles_post_ra>
